<compile_context>
chip_gen: v5e
topology: v5e:2x2
jax: 0.10.0
libtpu: 0.0.40
codegen_flags: <defaults>
</compile_context>

<pallas_src>
import functools

import jax
import jax.numpy as jnp
from jax.experimental import pallas as pl
from jax.experimental.pallas import tpu as pltpu


def _mlp_kernel(x_ref, w1_ref, b1_ref, w2_ref, b2_ref, o_ref):
    # x_ref : (TB, 10)   f32
    # w1_ref: (10, 256)  f32   (fc1 weight, transposed to (in, out))
    # b1_ref: (1, 256)   f32
    # w2_ref: (256, 2)   f32   (fc2 weight, transposed to (in, out))
    # b2_ref: (1, 2)     f32
    # o_ref : (TB, 2)    f32
    h = jnp.dot(x_ref[...], w1_ref[...], preferred_element_type=jnp.float32)
    h = jnp.maximum(h + b1_ref[...], 0.0)          # bias + ReLU on the VPU
    y = jnp.dot(h, w2_ref[...], preferred_element_type=jnp.float32)
    o_ref[...] = y + b2_ref[...]


def prepare_params(w1, b1, w2, b2):
    """One-time layout fixup (done at param init / model load, NOT per call):
    transpose weights to (in, out) and make biases 2-D rows.

    w1: (256, 10) f32 (PyTorch out x in), b1: (256,), w2: (2, 256), b2: (2,)
    """
    w1_t = jnp.asarray(w1, jnp.float32).T              # (10, 256)
    b1_r = jnp.asarray(b1, jnp.float32).reshape(1, -1)  # (1, 256)
    w2_t = jnp.asarray(w2, jnp.float32).T              # (256, 2)
    b2_r = jnp.asarray(b2, jnp.float32).reshape(1, -1)  # (1, 2)
    return w1_t, b1_r, w2_t, b2_r


@functools.partial(jax.jit, static_argnames=("tb",))
def light_nn_forward(x, params, *, tb=512):
    """Forward pass of LightNeuralNetwork.

    x:      (B, 10) float32
    params: output of prepare_params(...)
    tb:     batch tile size (rows per grid step).  512-2048 is the sweet spot
            for large B; it is clamped down for small batches and kept a
            multiple of 8 (f32 sublane) so block shapes tile cleanly.
    returns (B, 2) float32
    """
    w1_t, b1_r, w2_t, b2_r = params
    B, D = x.shape
    assert D == 10, "LightNeuralNetwork expects 10 input features"

    x_in = x.astype(jnp.float32)

    # Tile size: multiple of 8, no larger than the (sublane-padded) batch.
    tb = max(8, min(tb, ((B + 7) // 8) * 8))
    n_tiles = pl.cdiv(B, tb)
    B_pad = n_tiles * tb

    if B_pad != B:
        # Pad the tail tile; padded rows are computed and sliced off below.
        x_in = jnp.pad(x_in, ((0, B_pad - B), (0, 0)))

    out = pl.pallas_call(
        _mlp_kernel,
        out_shape=jax.ShapeDtypeStruct((B_pad, 2), jnp.float32),
        grid=(n_tiles,),
        in_specs=[
            pl.BlockSpec((tb, 10), lambda i: (i, 0)),        # x: tiled on batch
            pl.BlockSpec(w1_t.shape, lambda i: (0, 0)),      # weights resident
            pl.BlockSpec(b1_r.shape, lambda i: (0, 0)),
            pl.BlockSpec(w2_t.shape, lambda i: (0, 0)),
            pl.BlockSpec(b2_r.shape, lambda i: (0, 0)),
        ],
        out_specs=pl.BlockSpec((tb, 2), lambda i: (i, 0)),
        compiler_params=pltpu.CompilerParams(
            # Independent batch tiles -> parallel (shards across v7x's 2 TCs).
            dimension_semantics=("parallel",),
        ),
    )(x_in, w1_t, b1_r, w2_t, b2_r)

    return out[:B] if B_pad != B else out


def _init_params(key):
    """Deterministic init matching PyTorch nn.Linear default:
    U(-1/sqrt(fan_in), 1/sqrt(fan_in)) for both weight and bias."""
    k1, k2, k3, k4 = jax.random.split(key, 4)
    bound1 = 1.0 / jnp.sqrt(10.0)
    bound2 = 1.0 / jnp.sqrt(256.0)
    w1 = jax.random.uniform(k1, (256, 10), jnp.float32, -bound1, bound1)
    b1 = jax.random.uniform(k2, (256,), jnp.float32, -bound1, bound1)
    w2 = jax.random.uniform(k3, (2, 256), jnp.float32, -bound2, bound2)
    b2 = jax.random.uniform(k4, (2,), jnp.float32, -bound2, bound2)
    return w1, b1, w2, b2


if __name__ == "__main__":
    key = jax.random.PRNGKey(0)
    k_params, k_x = jax.random.split(key)

    w1, b1, w2, b2 = _init_params(k_params)
    params = prepare_params(w1, b1, w2, b2)   # layout fixup hoisted out of fwd

    # Small demo batch that is NOT a multiple of the tile -> exercises the
    # multi-tile grid + tail padding path (tb=32 => 4 grid steps).
    B = 100
    x = jax.random.normal(k_x, (B, 10), jnp.float32)

    out = light_nn_forward(x, params, tb=32)
    out = jax.block_until_ready(out)
    assert out.shape == (B, 2)

    # Reference: full-f32 PyTorch-equivalent forward.  The kernel is f32
    # throughout, so this should match tightly (accumulation order only).
    ref_f32 = jnp.maximum(x @ w1.T + b1, 0.0) @ w2.T + b2
    assert jnp.allclose(out, ref_f32, atol=1e-4, rtol=1e-4), \
        "mismatch vs f32 reference"

    # Also exercise the single-tile (no padding) fast path.
    out_big_tile = jax.block_until_ready(light_nn_forward(x, params, tb=512))
    assert jnp.allclose(out_big_tile, ref_f32, atol=1e-4, rtol=1e-4), \
        "mismatch vs f32 reference (single-tile path)"

    print("KERNEL_OK")
</pallas_src>

<mosaic_0001>
module attributes {stable_mosaic.version = 11 : i64} {
  func.func @_mlp_kernel(%arg0: i32, %arg1: memref<32x10xf32, #tpu.memory_space<vmem>>, %arg2: memref<10x256xf32, #tpu.memory_space<vmem>>, %arg3: memref<1x256xf32, #tpu.memory_space<vmem>>, %arg4: memref<256x2xf32, #tpu.memory_space<vmem>>, %arg5: memref<1x2xf32, #tpu.memory_space<vmem>>, %arg6: memref<32x2xf32, #tpu.memory_space<vmem>>) attributes {dimension_semantics = [#tpu.dimension_semantics<parallel>], iteration_bounds = array<i64: 4>, scalar_prefetch = 0 : i64, scratch_operands = 0 : i64, tpu.core_type = #tpu.core_type<tc>, window_params = [{transform_indices = @transform_0, window_bounds = array<i64: 32, 10>}, {pipeline_mode = #tpu.pipeline_mode<synchronous>, transform_indices = @transform_1, window_bounds = array<i64: 10, 256>}, {pipeline_mode = #tpu.pipeline_mode<synchronous>, transform_indices = @transform_2, window_bounds = array<i64: 1, 256>}, {pipeline_mode = #tpu.pipeline_mode<synchronous>, transform_indices = @transform_3, window_bounds = array<i64: 256, 2>}, {pipeline_mode = #tpu.pipeline_mode<synchronous>, transform_indices = @transform_4, window_bounds = array<i64: 1, 2>}, {transform_indices = @transform_5, window_bounds = array<i64: 32, 2>}]} {
    %c0 = arith.constant 0 : index
    %c0_0 = arith.constant 0 : index
    %0 = vector.load %arg1[%c0, %c0_0] : memref<32x10xf32, #tpu.memory_space<vmem>>, vector<32x10xf32>
    %c0_1 = arith.constant 0 : index
    %c0_2 = arith.constant 0 : index
    %1 = vector.load %arg2[%c0_1, %c0_2] : memref<10x256xf32, #tpu.memory_space<vmem>>, vector<10x256xf32>
    %cst = arith.constant dense<0.000000e+00> : vector<32x256xf32>
    %2 = tpu.matmul %0, %1, %cst {dimension_numbers = #tpu.dot_dimension_numbers<[1], [0], [0], [1], [0, 0, 1, 1], [], []>} : vector<32x10xf32>, vector<10x256xf32>, vector<32x256xf32> -> vector<32x256xf32>
    %c0_3 = arith.constant 0 : index
    %c0_4 = arith.constant 0 : index
    %3 = vector.load %arg3[%c0_3, %c0_4] : memref<1x256xf32, #tpu.memory_space<vmem>>, vector<1x256xf32>
    %4 = vector.broadcast %3 : vector<1x256xf32> to vector<32x256xf32>
    %5 = arith.addf %2, %4 : vector<32x256xf32>
    %cst_5 = arith.constant 0.000000e+00 : f32
    %6 = vector.broadcast %cst_5 : f32 to vector<32x256xf32>
    %7 = arith.maximumf %5, %6 : vector<32x256xf32>
    %c0_6 = arith.constant 0 : index
    %c0_7 = arith.constant 0 : index
    %8 = vector.load %arg4[%c0_6, %c0_7] : memref<256x2xf32, #tpu.memory_space<vmem>>, vector<256x2xf32>
    %cst_8 = arith.constant dense<0.000000e+00> : vector<32x2xf32>
    %9 = tpu.matmul %7, %8, %cst_8 {dimension_numbers = #tpu.dot_dimension_numbers<[1], [0], [0], [1], [0, 0, 1, 1], [], []>} : vector<32x256xf32>, vector<256x2xf32>, vector<32x2xf32> -> vector<32x2xf32>
    %c0_9 = arith.constant 0 : index
    %c0_10 = arith.constant 0 : index
    %10 = vector.load %arg5[%c0_9, %c0_10] : memref<1x2xf32, #tpu.memory_space<vmem>>, vector<1x2xf32>
    %11 = vector.broadcast %10 : vector<1x2xf32> to vector<32x2xf32>
    %12 = arith.addf %9, %11 : vector<32x2xf32>
    %c0_11 = arith.constant 0 : index
    %c0_12 = arith.constant 0 : index
    %13 = vector.load %arg6[%c0_11, %c0_12] : memref<32x2xf32, #tpu.memory_space<vmem>>, vector<32x2xf32>
    tpu.vector_store %arg6[%c0_11, %c0_12], %12 {strides = array<i32>} : memref<32x2xf32, #tpu.memory_space<vmem>>, vector<32x2xf32>,
    return
  }
  func.func @transform_0(%arg0: i32) -> (i32, i32) {
    %c0_i32 = arith.constant 0 : i32
    %c0_i32_0 = arith.constant 0 : i32
    return %arg0, %c0_i32 : i32, i32
  }
  func.func @transform_1(%arg0: i32) -> (i32, i32) {
    %c0_i32 = arith.constant 0 : i32
    %c0_i32_0 = arith.constant 0 : i32
    %c0_i32_1 = arith.constant 0 : i32
    return %c0_i32, %c0_i32_0 : i32, i32
  }
  func.func @transform_2(%arg0: i32) -> (i32, i32) {
    %c0_i32 = arith.constant 0 : i32
    %c0_i32_0 = arith.constant 0 : i32
    %c0_i32_1 = arith.constant 0 : i32
    return %c0_i32, %c0_i32_0 : i32, i32
  }
  func.func @transform_3(%arg0: i32) -> (i32, i32) {
    %c0_i32 = arith.constant 0 : i32
    %c0_i32_0 = arith.constant 0 : i32
    %c0_i32_1 = arith.constant 0 : i32
    return %c0_i32, %c0_i32_0 : i32, i32
  }
  func.func @transform_4(%arg0: i32) -> (i32, i32) {
    %c0_i32 = arith.constant 0 : i32
    %c0_i32_0 = arith.constant 0 : i32
    %c0_i32_1 = arith.constant 0 : i32
    return %c0_i32, %c0_i32_0 : i32, i32
  }
  func.func @transform_5(%arg0: i32) -> (i32, i32) {
    %c0_i32 = arith.constant 0 : i32
    %c0_i32_0 = arith.constant 0 : i32
    return %arg0, %c0_i32 : i32, i32
  }
}

</mosaic_0001>

<bundles_post_ra>
// kernel: light_nn_forward.1
= control target key start
LH: loop header
LB: loop body
LE: loop exit
PB: predicated region body
PF: predicated region fallthrough
CT: control target
= control target key end

     0   :  { %s583_s18 = smov 0   ;;  %s739_s0 = inlined_call_operand.vmem [shape: f32[128,10], index: 0, kind: input, shape index: {}]   ;;  %s740_s1 = inlined_call_operand.vmem [shape: f32[10,256], index: 1, kind: input, shape index: {}]   ;;  %s741_s2 = inlined_call_operand.vmem [shape: f32[1,256], index: 2, kind: input, shape index: {}]   ;;  %s742_s3 = inlined_call_operand.vmem [shape: f32[256,2], index: 3, kind: input, shape index: {}]   ;;  %s743_s4 = inlined_call_operand.vmem [shape: f32[1,2], index: 4, kind: input, shape index: {}]   ;;  %s744_s5 = inlined_call_operand.vmem [shape: f32[128,2], index: 5, kind: output, shape index: {}]  }
   0x1 LB: > { %s483_s19 = sadd.s32 4294967295, %s551_s18   ;;  %p487_p0 = scmp.ge.s32.totalorder %s551_s18, 1  ;;  %s551_s18 = sphi %s583_s18, %s15_s18  }
   0x2   : > { %p188_p1 = scmp.lt.s32.totalorder %s551_s18, 5 }
   0x4   : > { %p189_p2 = pnand %p487_p0, %p188_p1 }
   0x5   : > { %s488_s26 = sshll.u32 (!%p189_p2), %s483_s19, 2 }
   0x6   : > { %192 = sbr.rel (%p189_p2) target bundleno = 310 (0x136), region = 40  ;;  %p217_p3 = scmp.lt.s32.totalorder (!%p189_p2), %s488_s26, 15 }
   0xb   : > { %v234_v0 = vld [vmem:[%s740_s1 + $0x10] sm:$0x3]  ;;  %vm255_vm0 = vcmask 1041408   ;;  %v232_v1 = vld [vmem:[%s740_s1] sm:$0xff]  ;;  %v235_v2 = vld [vmem:[%s740_s1 + $0x18] sm:$0x3] }
   0xc   : > { %492 = vmatpush.msk.msra.mxu0 %vm255_vm0, %v234_v0  ;;  %497 = vmatpush.msk.msra.mxu1 %vm255_vm0, %v235_v2  ;;  %v233_v3 = vld [vmem:[%s740_s1 + $0x8] sm:$0xff]  ;;  %v343_v4 = vld [vmem:[%s742_s3 + $0x78] sm:$0xff]  ;;  %v342_v6 = vld [vmem:[%s742_s3 + $0x70] sm:$0xff]  ;;  %s746_s26 = smov (!%p217_p3, %s488_s26), 15  ;;  %vm242_vm1 = vcmask 80896   ;;  %vm422_vm2 = vcmask 15360  }
   0xd   : > { %v359_v5 = vld [vmem:[%s742_s3 + $0xf8] sm:$0xff]  ;;  %504 = vmatpush.msra.mxu2 %v343_v4  ;;  %v358_v7 = vld [vmem:[%s742_s3 + $0xf0] sm:$0xff]  ;;  %v341_v8 = vld [vmem:[%s742_s3 + $0x68] sm:$0xff]  ;;  %s489_s16 = sshll.u32 %s746_s26, 3 }
   0xe   : > { %277 = vmatpush.msra.mxu0 %v232_v1  ;;  %306 = vmatpush.msra.mxu1 %v233_v3  ;;  %v357_v9 = vld [vmem:[%s742_s3 + $0xe8] sm:$0xff]  ;;  %s629_s20 = scalar_lea.vmem %s739_s0, %s489_s16  ;;  %v340_v10 = vld [vmem:[%s742_s3 + $0x60] sm:$0xff]  ;;  %v339_v13 = vld [vmem:[%s742_s3 + $0x58] sm:$0xff]  ;;  %s226_s12 = scalar_lea.vmem %s744_s5, %s489_s16 }
   0xf   : > { %505 = vmatpush.msra.mxu2 %v342_v6  ;;  %520 = vmatpush.msra.mxu3 %v359_v5  ;;  %v356_v11 = vld [vmem:[%s742_s3 + $0xe0] sm:$0xff]  ;;  %v355_v14 = vld [vmem:[%s742_s3 + $0xd8] sm:$0xff]  ;;  %v338_v15 = vld [vmem:[%s742_s3 + $0x50] sm:$0xff] }
  0x10   : > { %364 = vmatpush.msrb.mxu0 %v343_v4  ;;  %393 = vmatpush.msrb.mxu1 %v359_v5  ;;  %v228_v12 = vld [vmem:[%s629_s20] sm:$0xff]  ;;  %v354_v16 = vld [vmem:[%s742_s3 + $0xd0] sm:$0xff]  ;;  %v337_v17 = vld [vmem:[%s742_s3 + $0x48] sm:$0xff] }
  0x11   : > { %506 = vmatpush.msra.mxu2 %v341_v8  ;;  %521 = vmatpush.msra.mxu3 %v358_v7  ;;  %v353_v18 = vld [vmem:[%s742_s3 + $0xc8] sm:$0xff]  ;;  %v336_v20 = vld [vmem:[%s742_s3 + $0x40] sm:$0xff]  ;;  %v335_v22 = vld [vmem:[%s742_s3 + $0x38] sm:$0xff] }
  0x12   : > { %365 = vmatpush.msrb.mxu0 %v342_v6  ;;  %394 = vmatpush.msrb.mxu1 %v358_v7  ;;  %v229_v19 = vld [vmem:[%s629_s20 + $0x8] sm:$0xff]  ;;  %v352_v21 = vld [vmem:[%s742_s3 + $0xc0] sm:$0xff]  ;;  %v351_v23 = vld [vmem:[%s742_s3 + $0xb8] sm:$0xff] }
  0x13   : > { %493 = vmatmul.msk.f32.vlgmr.msra.gmra.mxu0 %vm242_vm1, %v228_v12  ;;  %498 = vmatmul.msk.f32.vlgmr.msra.gmra.mxu1 %vm242_vm1, %v228_v12  ;;  %v334_v24 = vld [vmem:[%s742_s3 + $0x30] sm:$0xff]  ;;  %v333_v26 = vld [vmem:[%s742_s3 + $0x28] sm:$0xff]  ;;  %v332_v29 = vld [vmem:[%s742_s3 + $0x20] sm:$0xff] }
  0x14   : > { %366 = vmatpush.msrb.mxu0 %v341_v8  ;;  %395 = vmatpush.msrb.mxu1 %v357_v9  ;;  %v350_v25 = vld [vmem:[%s742_s3 + $0xb0] sm:$0xff]  ;;  %v349_v27 = vld [vmem:[%s742_s3 + $0xa8] sm:$0xff]  ;;  %v348_v30 = vld [vmem:[%s742_s3 + $0xa0] sm:$0xff] }
  0x15   : > { %507 = vmatpush.msra.mxu2 %v340_v10  ;;  %522 = vmatpush.msra.mxu3 %v357_v9  ;;  %v230_v28 = vld [vmem:[%s629_s20 + $0x10] sm:$0xff]  ;;  %v331_v31 = vld [vmem:[%s742_s3 + $0x18] sm:$0xff]  ;;  %v329_v35 = vld [vmem:[%s742_s3 + $0x8] sm:$0xff] }
  0x16   : > { %367 = vmatpush.msrb.mxu0 %v340_v10  ;;  %396 = vmatpush.msrb.mxu1 %v356_v11  ;;  %v231_v32 = vld [vmem:[%s629_s20 + $0x18] sm:$0xff]  ;;  %v330_v33 = vld [vmem:[%s742_s3 + $0x10] sm:$0xff]  ;;  %v328_v37 = vld [vmem:[%s742_s3] sm:$0xff] }
  0x17   : > { %508 = vmatpush.msra.mxu2 %v339_v13  ;;  %523 = vmatpush.msra.mxu3 %v356_v11  ;;  %v347_v34 = vld [vmem:[%s742_s3 + $0x98] sm:$0xff]  ;;  %v346_v36 = vld [vmem:[%s742_s3 + $0x90] sm:$0xff]  ;;  %v345_v38 = vld [vmem:[%s742_s3 + $0x88] sm:$0xff] }
  0x18   : > { %368 = vmatpush.msrb.mxu0 %v339_v13  ;;  %397 = vmatpush.msrb.mxu1 %v355_v14  ;;  %v344_v39 = vld [vmem:[%s742_s3 + $0x80] sm:$0xff] }
  0x19   : > { %509 = vmatpush.msra.mxu2 %v338_v15  ;;  %524 = vmatpush.msra.mxu3 %v355_v14  ;;  %v236_v40 = vld [vmem:[%s741_s2] sm:$0x3] }
  0x1a   : > { %369 = vmatpush.msrb.mxu0 %v338_v15  ;;  %398 = vmatpush.msrb.mxu1 %v354_v16  ;;  %v238_v41 = vperm.slane %v236_v40, 0  ;;  %v239_v42 = vperm.slane %v236_v40, 1  ;;  %v544_v3 = vld [vmem:[%s743_s4] ss:$0 sm:$0xff] }
  0x1b   : > { %494 = vmatmul.msk.f32.gmra.mxu0 %vm242_vm1, %v229_v19  ;;  %499 = vmatmul.msk.f32.gmra.mxu1 %vm242_vm1, %v229_v19 }
  0x1c   : > { %370 = vmatpush.msrb.mxu0 %v337_v17  ;;  %399 = vmatpush.msrb.mxu1 %v353_v18 }
  0x1d   : > { %510 = vmatpush.msra.mxu2 %v337_v17  ;;  %525 = vmatpush.msra.mxu3 %v354_v16 }
  0x1e   : > { %371 = vmatpush.msrb.mxu0 %v336_v20  ;;  %400 = vmatpush.msrb.mxu1 %v352_v21 }
  0x1f   : > { %511 = vmatpush.msra.mxu2 %v336_v20  ;;  %526 = vmatpush.msra.mxu3 %v353_v18 }
  0x20   : > { %372 = vmatpush.msrb.mxu0 %v335_v22  ;;  %401 = vmatpush.msrb.mxu1 %v351_v23 }
  0x21   : > { %512 = vmatpush.msra.mxu2 %v335_v22  ;;  %527 = vmatpush.msra.mxu3 %v352_v21 }
  0x22   : > { %373 = vmatpush.msrb.mxu0 %v334_v24  ;;  %402 = vmatpush.msrb.mxu1 %v350_v25 }
  0x23   : > { %495 = vmatmul.msk.f32.gmra.mxu0 %vm242_vm1, %v230_v28  ;;  %500 = vmatmul.msk.f32.gmra.mxu1 %vm242_vm1, %v230_v28 }
  0x24   : > { %374 = vmatpush.msrb.mxu0 %v333_v26  ;;  %403 = vmatpush.msrb.mxu1 %v349_v27 }
  0x25   : > { %513 = vmatpush.msra.mxu2 %v334_v24  ;;  %528 = vmatpush.msra.mxu3 %v351_v23 }
  0x26   : > { %375 = vmatpush.msrb.mxu0 %v332_v29  ;;  %404 = vmatpush.msrb.mxu1 %v348_v30 }
  0x27   : > { %514 = vmatpush.msra.mxu2 %v333_v26  ;;  %529 = vmatpush.msra.mxu3 %v350_v25 }
  0x28   : > { %376 = vmatpush.msrb.mxu0 %v331_v31  ;;  %405 = vmatpush.msrb.mxu1 %v347_v34 }
  0x29   : > { %515 = vmatpush.msra.mxu2 %v332_v29  ;;  %530 = vmatpush.msra.mxu3 %v349_v27 }
  0x2a   : > { %377 = vmatpush.msrb.mxu0 %v330_v33  ;;  %406 = vmatpush.msrb.mxu1 %v346_v36 }
  0x2b   : > { %496 = vmatmul.msk.f32.gmra.mxu0 %vm242_vm1, %v231_v32  ;;  %501 = vmatmul.msk.f32.gmra.mxu1 %vm242_vm1, %v231_v32 }
  0x2c   : > { %516 = vmatpush.msra.mxu2 %v331_v31  ;;  %531 = vmatpush.msra.mxu3 %v348_v30 }
  0x2d   : > { %378 = vmatpush.msrb.mxu0 %v329_v35  ;;  %407 = vmatpush.msrb.mxu1 %v345_v38 }
  0x2e   : > { %517 = vmatpush.msra.mxu2 %v330_v33  ;;  %532 = vmatpush.msra.mxu3 %v347_v34 }
  0x2f   : > { %379 = vmatpush.msrb.mxu0 %v328_v37  ;;  %408 = vmatpush.msrb.mxu1 %v344_v39 }
  0x30   : > { %518 = vmatpush.msra.mxu2 %v329_v35  ;;  %533 = vmatpush.msra.mxu3 %v346_v36 }
  0x32   : > { %519 = vmatpush.msra.mxu2 %v328_v37  ;;  %534 = vmatpush.msra.mxu3 %v345_v38 }
  0x34   : > { %535 = vmatpush.msra.mxu3 %v344_v39 }
  0x90   : > { %v279_v43 = vpop.f32.mrf.mxu0  ;;  %v308_v44 = vpop.f32.mrf.mxu1 }
  0x91   : > { %v280_v45 = vadd.f32 %v279_v43, %v238_v41  ;;  %v309_v46 = vadd.f32 %v308_v44, %v239_v42 }
  0x93   : > { %v320_v47 = vmax.f32 %v280_v45, 0.0  ;;  %v321_v48 = vmax.f32 %v309_v46, 0.0 }
  0x95   : > { %380 = vmatmul.f32.vlgmr.msrb.gmra.mxu0 %v320_v47  ;;  %409 = vmatmul.f32.vlgmr.msrb.gmra.mxu1 %v321_v48 }
  0x98   : > { %v282_v49 = vpop.f32.mrf.mxu0  ;;  %v311_v50 = vpop.f32.mrf.mxu1 }
  0x99   : > { %v283_v51 = vadd.f32 %v282_v49, %v238_v41  ;;  %v312_v52 = vadd.f32 %v311_v50, %v239_v42 }
  0x9b   : > { %v322_v53 = vmax.f32 %v283_v51, 0.0  ;;  %v323_v54 = vmax.f32 %v312_v52, 0.0 }
  0x9d   : > { %383 = vmatmul.f32.vlgmr.msra.gmra.mxu2 %v322_v53  ;;  %412 = vmatmul.f32.vlgmr.msra.gmra.mxu3 %v323_v54 }
  0xa0   : > { %v285_v55 = vpop.f32.mrf.mxu0  ;;  %v314_v56 = vpop.f32.mrf.mxu1 }
  0xa1   : > { %v286_v57 = vadd.f32 %v285_v55, %v238_v41  ;;  %v315_v58 = vadd.f32 %v314_v56, %v239_v42 }
  0xa3   : > { %v324_v59 = vmax.f32 %v286_v57, 0.0  ;;  %v325_v60 = vmax.f32 %v315_v58, 0.0 }
  0xa5   : > { %386 = vmatmul.f32.gmra.mxu2 %v324_v59  ;;  %415 = vmatmul.f32.gmra.mxu3 %v325_v60 }
  0xa8   : > { %v288_v61 = vpop.f32.mrf.mxu0  ;;  %v317_v62 = vpop.f32.mrf.mxu1 }
  0xa9   : > { %v289_v63 = vadd.f32 %v288_v61, %v238_v41  ;;  %v318_v0 = vadd.f32 %v317_v62, %v239_v42 }
  0xab   : > { %v326_v1 = vmax.f32 %v289_v63, 0.0  ;;  %v327_v2 = vmax.f32 %v318_v0, 0.0 }
  0xad   : > { %389 = vmatmul.f32.gmra.mxu2 %v326_v1  ;;  %418 = vmatmul.f32.gmra.mxu3 %v327_v2 }
 0x112   : > { %v381_v4 = vpop.f32.mrf.mxu0  ;;  %v410_v5 = vpop.f32.mrf.mxu1 }
 0x113   : > { %v382_v6 = vadd.f32 %v544_v3, %v381_v4 }
 0x115   : > { %v411_v7 = vadd.f32 %v410_v5, %v382_v6 }
 0x117   : > { %423 = vst.msk [vmem:[%s226_s12] sm:$0xff] %vm422_vm2, %v411_v7 }
 0x120   : > { %v384_v8 = vpop.f32.mrf.mxu2  ;;  %v413_v9 = vpop.f32.mrf.mxu3 }
 0x121   : > { %v385_v10 = vadd.f32 %v544_v3, %v384_v8 }
 0x123   : > { %v414_v11 = vadd.f32 %v413_v9, %v385_v10 }
 0x125   : > { %424 = vst.msk [vmem:[%s226_s12 + $0x8] sm:$0xff] %vm422_vm2, %v414_v11 }
 0x128   : > { %v387_v12 = vpop.f32.mrf.mxu2  ;;  %v416_v13 = vpop.f32.mrf.mxu3 }
 0x129   : > { %v388_v14 = vadd.f32 %v544_v3, %v387_v12 }
 0x12b   : > { %v417_v15 = vadd.f32 %v416_v13, %v388_v14 }
 0x12d   : > { %425 = vst.msk [vmem:[%s226_s12 + $0x10] sm:$0xff] %vm422_vm2, %v417_v15 }
 0x130   : > { %v390_v16 = vpop.f32.mrf.mxu2  ;;  %v419_v17 = vpop.f32.mrf.mxu3 }
 0x131   : > { %v391_v18 = vadd.f32 %v544_v3, %v390_v16 }
 0x133   : > { %v420_v19 = vadd.f32 %v419_v17, %v391_v18 }
 0x135   : > { %426 = vst.msk [vmem:[%s226_s12 + $0x18] sm:$0xff] %vm422_vm2, %v420_v19 }
 0x136 PF: > { %s15_s18 = sadd.s32 1, %s551_s18  }
 0x137   : > { %p12_p4 = scmp.ge.s32.totalorder %s15_s18, 6  }
 0x139   :  { %14 = sbr.rel (!%p12_p4) target bundleno = 1 (0x1), region = 70 }

</bundles_post_ra>
